<compile_context>
chip_gen: v6e
topology: v6e:2x2x1
jax: 0.10.0
libtpu: 0.0.40
codegen_flags: <defaults>
</compile_context>

<pallas_src>
import jax
import jax.numpy as jnp
from jax import lax
from jax.experimental import pallas as pl
from jax.experimental.pallas import tpu as pltpu

_LANE = 128
_TILE_ROWS_MAX = 2048      # (2048,128) f32 = 1 MiB per input tile
_CHUNK_ROWS = 512          # in-kernel reduction chunk (bounds VMEM temporaries)
_NUM_SPLITS = 2            # leading "parallel" axis (both TCs on v7x; near-free on 1-TC chips)
_VMEM_LIMIT_BYTES = 32 * 1024 * 1024


def _round_up(x, m):
    return ((x + m - 1) // m) * m


def _make_sum_kernel(rows, tile_rows, chunk_rows, blocks_per_split, ops):
    """Build a kernel accumulating lane-wise sums of (p-t)^2 / |p-t| per stream.

    refs = (pred_0, true_0, pred_1, true_1, ..., out_0, out_1, ...); each out is
    an (8, 128) f32 accumulator block resident across the inner grid axis.
    """
    n_chunks = tile_rows // chunk_rows
    k = len(ops)

    def kernel(*refs):
        in_refs, out_refs = refs[:2 * k], refs[2 * k:]
        i = pl.program_id(1)

        @pl.when(i == 0)
        def _init():
            for o_ref in out_refs:
                o_ref[...] = jnp.zeros_like(o_ref)

        # Global (unclamped) block index -> number of valid rows in this block.
        # Grid steps past the last real block (index_map clamps them) get
        # valid_rows <= 0 and contribute nothing.
        g = pl.program_id(0) * blocks_per_split + i
        valid_rows = jnp.int32(rows) - g * jnp.int32(tile_rows)

        accs = [jnp.zeros((8, _LANE), jnp.float32) for _ in range(k)]
        for c in range(n_chunks):                      # static, fully unrolled
            r0 = c * chunk_rows
            row_ids = r0 + lax.broadcasted_iota(jnp.int32, (chunk_rows, _LANE), 0)
            m = row_ids < valid_rows
            for s in range(k):
                p = in_refs[2 * s][pl.ds(r0, chunk_rows), :].astype(jnp.float32)
                t = in_refs[2 * s + 1][pl.ds(r0, chunk_rows), :].astype(jnp.float32)
                # Mask BEFORE the nonlinearity so garbage in overhanging edge
                # blocks (undefined data) can never reach the sums.
                d = jnp.where(m, p - t, 0.0)
                v = d * d if ops[s] == "sq" else jnp.abs(d)
                # Tile-aligned reshape + leading-axis sum = pure VPU vreg adds.
                accs[s] = accs[s] + jnp.sum(
                    v.reshape(chunk_rows // 8, 8, _LANE), axis=0)
        for s in range(k):
            out_refs[s][...] += accs[s]

    return kernel


def _streamed_sums(pairs):
    """One fused HBM-streaming pass over (pred, true, op) pairs.

    All pairs must share one element count.  op in {"sq", "abs"}.
    Returns a list of f32 scalar sums (sum of (p-t)^2 or |p-t| per pair).
    """
    k = len(pairs)
    n = pairs[0][0].size
    rows = pl.cdiv(n, _LANE)

    def to_rows(x):
        flat = jnp.ravel(x)
        rem = n % _LANE
        if rem:
            # Uncommon case: pad only up to the next 128 multiple.  pred/true are
            # padded identically with zeros -> zero contribution to both sums.
            flat = jnp.pad(flat, (0, _LANE - rem))
        return flat.reshape(rows, _LANE)   # free bitcast when n % 128 == 0

    # Tile sizing: as large as sensible for HBM-roofline streaming, shrunk for
    # small inputs.  No host-side rounding of `rows`; the ragged edge block is
    # masked in-kernel.
    tile_rows = min(_TILE_ROWS_MAX, _round_up(pl.cdiv(rows, _NUM_SPLITS), 32))
    chunk_rows = min(_CHUNK_ROWS, tile_rows)
    tile_rows = _round_up(tile_rows, chunk_rows)
    total_blocks = pl.cdiv(rows, tile_rows)
    blocks_per_split = pl.cdiv(total_blocks, _NUM_SPLITS)

    def in_map(c, i):
        # Clamp grid steps that fall past the last real block; those steps
        # re-read the final block and are fully masked in-kernel.
        return (jnp.minimum(c * blocks_per_split + i, total_blocks - 1), 0)

    def out_map(c, i):
        return (c, 0)

    inputs = []
    for p, t, _ in pairs:
        inputs.append(to_rows(p))
        inputs.append(to_rows(t))

    kernel = _make_sum_kernel(rows, tile_rows, chunk_rows, blocks_per_split,
                              tuple(op for _, _, op in pairs))

    in_bytes = sum(int(x.size) * x.dtype.itemsize for x in inputs)
    out_bytes = k * _NUM_SPLITS * 8 * _LANE * 4
    outs = pl.pallas_call(
        kernel,
        out_shape=tuple(
            jax.ShapeDtypeStruct((_NUM_SPLITS * 8, _LANE), jnp.float32)
            for _ in range(k)),
        grid=(_NUM_SPLITS, blocks_per_split),
        in_specs=[pl.BlockSpec((tile_rows, _LANE), in_map)] * (2 * k),
        out_specs=tuple(pl.BlockSpec((8, _LANE), out_map) for _ in range(k)),
        compiler_params=pltpu.CompilerParams(
            dimension_semantics=("parallel", "arbitrary"),
            vmem_limit_bytes=_VMEM_LIMIT_BYTES,
        ),
        cost_estimate=pl.CostEstimate(
            flops=4 * n * k,
            transcendentals=0,
            bytes_accessed=in_bytes + out_bytes,
        ),
    )(*inputs)
    if not isinstance(outs, (tuple, list)):
        outs = (outs,)
    # Tiny final cross-lane / cross-split reduction in plain JAX.
    return [jnp.sum(o) for o in outs]


@jax.jit
def diffusion_loss(y_pred_1, y_true_1, y_pred_0, y_true_0, penalty_factor=1.0):
    """JAX/Pallas equivalent of the PyTorch `diffusion_loss.forward`."""
    n1 = y_pred_1.size   # nn.MSELoss default reduction='mean' over all elements
    n0 = y_pred_0.size   # nn.L1Loss  default reduction='mean' over all elements

    if n1 == n0:
        # Typical diffusion case: one fused pass streams all four tensors once.
        sum_sq, sum_abs = _streamed_sums(
            [(y_pred_1, y_true_1, "sq"), (y_pred_0, y_true_0, "abs")])
    else:
        # Different element counts: stream each pair at its own extent so the
        # smaller pair is never zero-padded (and re-read) up to the larger one.
        (sum_sq,) = _streamed_sums([(y_pred_1, y_true_1, "sq")])
        (sum_abs,) = _streamed_sums([(y_pred_0, y_true_0, "abs")])

    loss_mse = sum_sq / jnp.float32(n1)
    # penalty_factor is a traced scalar (no recompile if it changes per step).
    loss_mae = (sum_abs / jnp.float32(n0)) * jnp.asarray(penalty_factor, jnp.float32)
    return loss_mse + loss_mae


if __name__ == "__main__":
    key = jax.random.PRNGKey(0)
    k1, k2, k3, k4 = jax.random.split(key, 4)

    # Small diffusion-style tensors (PyTorch NCHW convention): batch=2, channels=4, 16x16.
    shape = (2, 4, 16, 16)
    y_pred_1 = jax.random.normal(k1, shape, dtype=jnp.float32)
    y_true_1 = jax.random.normal(k2, shape, dtype=jnp.float32)
    y_pred_0 = jax.random.normal(k3, shape, dtype=jnp.float32)
    y_true_0 = jax.random.normal(k4, shape, dtype=jnp.float32)

    penalty_factor = 1.0  # module default

    loss = diffusion_loss(y_pred_1, y_true_1, y_pred_0, y_true_0, penalty_factor)
    loss = jax.block_until_ready(loss)

    ref = (jnp.mean((y_pred_1 - y_true_1) ** 2)
           + penalty_factor * jnp.mean(jnp.abs(y_pred_0 - y_true_0)))
    assert jnp.allclose(loss, ref, rtol=1e-5, atol=1e-5), (loss, ref)

    # Exercise the non-128-multiple tail, ragged-edge masking and unequal-size paths.
    shp1, shp0 = (5, 7, 29), (2, 4, 16, 16)
    a1 = jax.random.normal(k1, shp1, dtype=jnp.float32)
    b1 = jax.random.normal(k2, shp1, dtype=jnp.float32)
    a0 = jax.random.normal(k3, shp0, dtype=jnp.float32)
    b0 = jax.random.normal(k4, shp0, dtype=jnp.float32)
    loss2 = jax.block_until_ready(diffusion_loss(a1, b1, a0, b0, 0.5))
    ref2 = jnp.mean((a1 - b1) ** 2) + 0.5 * jnp.mean(jnp.abs(a0 - b0))
    assert jnp.allclose(loss2, ref2, rtol=1e-5, atol=1e-5), (loss2, ref2)

    print("KERNEL_OK")
</pallas_src>

<mosaic_0001>
module attributes {stable_mosaic.version = 11 : i64} {
  func.func @kernel(%arg0: i32, %arg1: i32, %arg2: memref<32x128xf32, #tpu.memory_space<vmem>>, %arg3: memref<32x128xf32, #tpu.memory_space<vmem>>, %arg4: memref<32x128xf32, #tpu.memory_space<vmem>>, %arg5: memref<32x128xf32, #tpu.memory_space<vmem>>, %arg6: memref<8x128xf32, #tpu.memory_space<vmem>>, %arg7: memref<8x128xf32, #tpu.memory_space<vmem>>) attributes {dimension_semantics = [#tpu.dimension_semantics<parallel>, #tpu.dimension_semantics<arbitrary>], iteration_bounds = array<i64: 2, 1>, scalar_prefetch = 0 : i64, scratch_operands = 0 : i64, tpu.core_type = #tpu.core_type<tc>, window_params = [{transform_indices = @transform_0, window_bounds = array<i64: 32, 128>}, {transform_indices = @transform_1, window_bounds = array<i64: 32, 128>}, {transform_indices = @transform_2, window_bounds = array<i64: 32, 128>}, {transform_indices = @transform_3, window_bounds = array<i64: 32, 128>}, {transform_indices = @transform_4, window_bounds = array<i64: 8, 128>}, {transform_indices = @transform_5, window_bounds = array<i64: 8, 128>}]} {
    %c0_i32 = arith.constant 0 : i32
    %0 = arith.cmpi eq, %arg1, %c0_i32 : i32
    %1 = arith.extui %0 : i1 to i32
    %c0_i32_0 = arith.constant 0 : i32
    %2 = arith.cmpi ne, %1, %c0_i32_0 : i32
    scf.if %2 {
      %cst_22 = arith.constant 0.000000e+00 : f32
      %38 = vector.broadcast %cst_22 : f32 to vector<8x128xf32>
      %c0_23 = arith.constant 0 : index
      %c0_24 = arith.constant 0 : index
      %39 = vector.load %arg6[%c0_23, %c0_24] : memref<8x128xf32, #tpu.memory_space<vmem>>, vector<8x128xf32>
      tpu.vector_store %arg6[%c0_23, %c0_24], %38 {strides = array<i32>} : memref<8x128xf32, #tpu.memory_space<vmem>>, vector<8x128xf32>,
      %cst_25 = arith.constant 0.000000e+00 : f32
      %40 = vector.broadcast %cst_25 : f32 to vector<8x128xf32>
      %c0_26 = arith.constant 0 : index
      %c0_27 = arith.constant 0 : index
      %41 = vector.load %arg7[%c0_26, %c0_27] : memref<8x128xf32, #tpu.memory_space<vmem>>, vector<8x128xf32>
      tpu.vector_store %arg7[%c0_26, %c0_27], %40 {strides = array<i32>} : memref<8x128xf32, #tpu.memory_space<vmem>>, vector<8x128xf32>,
    } else {
    }
    %c1_i32 = arith.constant 1 : i32
    %3 = arith.muli %arg0, %c1_i32 : i32
    %4 = arith.addi %3, %arg1 : i32
    %c32_i32 = arith.constant 32 : i32
    %5 = arith.muli %4, %c32_i32 : i32
    %c16_i32 = arith.constant 16 : i32
    %6 = arith.subi %c16_i32, %5 : i32
    %cst = arith.constant 0.000000e+00 : f32
    %7 = vector.broadcast %cst : f32 to vector<8x128xf32>
    %cst_1 = arith.constant 0.000000e+00 : f32
    %8 = vector.broadcast %cst_1 : f32 to vector<8x128xf32>
    %9 = tpu.iota {dimensions = array<i32: 0>} : vector<32x128xi32>
    %c0_i32_2 = arith.constant 0 : i32
    %10 = vector.broadcast %c0_i32_2 : i32 to vector<32x128xi32>
    %11 = arith.addi %10, %9 : vector<32x128xi32>
    %12 = vector.broadcast %6 : i32 to vector<32x128xi32>
    %13 = arith.cmpi slt, %11, %12 : vector<32x128xi32>
    %c0 = arith.constant 0 : index
    %c0_3 = arith.constant 0 : index
    %14 = vector.load %arg2[%c0, %c0_3] : memref<32x128xf32, #tpu.memory_space<vmem>>, vector<32x128xf32>
    %c0_4 = arith.constant 0 : index
    %c0_5 = arith.constant 0 : index
    %15 = vector.load %arg3[%c0_4, %c0_5] : memref<32x128xf32, #tpu.memory_space<vmem>>, vector<32x128xf32>
    %16 = arith.subf %14, %15 : vector<32x128xf32>
    %cst_6 = arith.constant 0.000000e+00 : f32
    %17 = vector.broadcast %cst_6 : f32 to vector<32x128xf32>
    %18 = arith.select %13, %16, %17 : vector<32x128xi1>, vector<32x128xf32>
    %19 = arith.mulf %18, %18 : vector<32x128xf32>
    %20 = vector.shape_cast %19 : vector<32x128xf32> to vector<4x8x128xf32>
    %cst_7 = arith.constant dense<0.000000e+00> : vector<8x128xf32>
    %21 = vector.multi_reduction <add>, %20, %cst_7 [0] : vector<4x8x128xf32> to vector<8x128xf32>
    %22 = arith.addf %7, %21 : vector<8x128xf32>
    %c0_8 = arith.constant 0 : index
    %c0_9 = arith.constant 0 : index
    %23 = vector.load %arg4[%c0_8, %c0_9] : memref<32x128xf32, #tpu.memory_space<vmem>>, vector<32x128xf32>
    %c0_10 = arith.constant 0 : index
    %c0_11 = arith.constant 0 : index
    %24 = vector.load %arg5[%c0_10, %c0_11] : memref<32x128xf32, #tpu.memory_space<vmem>>, vector<32x128xf32>
    %25 = arith.subf %23, %24 : vector<32x128xf32>
    %cst_12 = arith.constant 0.000000e+00 : f32
    %26 = vector.broadcast %cst_12 : f32 to vector<32x128xf32>
    %27 = arith.select %13, %25, %26 : vector<32x128xi1>, vector<32x128xf32>
    %28 = math.absf %27 : vector<32x128xf32>
    %29 = vector.shape_cast %28 : vector<32x128xf32> to vector<4x8x128xf32>
    %cst_13 = arith.constant dense<0.000000e+00> : vector<8x128xf32>
    %30 = vector.multi_reduction <add>, %29, %cst_13 [0] : vector<4x8x128xf32> to vector<8x128xf32>
    %31 = arith.addf %8, %30 : vector<8x128xf32>
    %c0_14 = arith.constant 0 : index
    %c0_15 = arith.constant 0 : index
    %32 = vector.load %arg6[%c0_14, %c0_15] : memref<8x128xf32, #tpu.memory_space<vmem>>, vector<8x128xf32>
    %33 = arith.addf %32, %22 : vector<8x128xf32>
    %c0_16 = arith.constant 0 : index
    %c0_17 = arith.constant 0 : index
    %34 = vector.load %arg6[%c0_16, %c0_17] : memref<8x128xf32, #tpu.memory_space<vmem>>, vector<8x128xf32>
    tpu.vector_store %arg6[%c0_16, %c0_17], %33 {strides = array<i32>} : memref<8x128xf32, #tpu.memory_space<vmem>>, vector<8x128xf32>,
    %c0_18 = arith.constant 0 : index
    %c0_19 = arith.constant 0 : index
    %35 = vector.load %arg7[%c0_18, %c0_19] : memref<8x128xf32, #tpu.memory_space<vmem>>, vector<8x128xf32>
    %36 = arith.addf %35, %31 : vector<8x128xf32>
    %c0_20 = arith.constant 0 : index
    %c0_21 = arith.constant 0 : index
    %37 = vector.load %arg7[%c0_20, %c0_21] : memref<8x128xf32, #tpu.memory_space<vmem>>, vector<8x128xf32>
    tpu.vector_store %arg7[%c0_20, %c0_21], %36 {strides = array<i32>} : memref<8x128xf32, #tpu.memory_space<vmem>>, vector<8x128xf32>,
    return
  }
  func.func @transform_0(%arg0: i32, %arg1: i32) -> (i32, i32) {
    %c1_i32 = arith.constant 1 : i32
    %0 = arith.muli %arg0, %c1_i32 : i32
    %1 = arith.addi %0, %arg1 : i32
    %c0_i32 = arith.constant 0 : i32
    %2 = arith.minsi %1, %c0_i32 : i32
    %c0_i32_0 = arith.constant 0 : i32
    %c0_i32_1 = arith.constant 0 : i32
    return %2, %c0_i32_0 : i32, i32
  }
  func.func @transform_1(%arg0: i32, %arg1: i32) -> (i32, i32) {
    %c1_i32 = arith.constant 1 : i32
    %0 = arith.muli %arg0, %c1_i32 : i32
    %1 = arith.addi %0, %arg1 : i32
    %c0_i32 = arith.constant 0 : i32
    %2 = arith.minsi %1, %c0_i32 : i32
    %c0_i32_0 = arith.constant 0 : i32
    %c0_i32_1 = arith.constant 0 : i32
    return %2, %c0_i32_0 : i32, i32
  }
  func.func @transform_2(%arg0: i32, %arg1: i32) -> (i32, i32) {
    %c1_i32 = arith.constant 1 : i32
    %0 = arith.muli %arg0, %c1_i32 : i32
    %1 = arith.addi %0, %arg1 : i32
    %c0_i32 = arith.constant 0 : i32
    %2 = arith.minsi %1, %c0_i32 : i32
    %c0_i32_0 = arith.constant 0 : i32
    %c0_i32_1 = arith.constant 0 : i32
    return %2, %c0_i32_0 : i32, i32
  }
  func.func @transform_3(%arg0: i32, %arg1: i32) -> (i32, i32) {
    %c1_i32 = arith.constant 1 : i32
    %0 = arith.muli %arg0, %c1_i32 : i32
    %1 = arith.addi %0, %arg1 : i32
    %c0_i32 = arith.constant 0 : i32
    %2 = arith.minsi %1, %c0_i32 : i32
    %c0_i32_0 = arith.constant 0 : i32
    %c0_i32_1 = arith.constant 0 : i32
    return %2, %c0_i32_0 : i32, i32
  }
  func.func @transform_4(%arg0: i32, %arg1: i32) -> (i32, i32) {
    %c0_i32 = arith.constant 0 : i32
    %c0_i32_0 = arith.constant 0 : i32
    return %arg0, %c0_i32 : i32, i32
  }
  func.func @transform_5(%arg0: i32, %arg1: i32) -> (i32, i32) {
    %c0_i32 = arith.constant 0 : i32
    %c0_i32_0 = arith.constant 0 : i32
    return %arg0, %c0_i32 : i32, i32
  }
}

</mosaic_0001>

<bundles_post_ra>
// kernel: diffusion_loss.1
= control target key start
LH: loop header
LB: loop body
LE: loop exit
PB: predicated region body
PF: predicated region fallthrough
CT: control target
= control target key end

     0   :  { %s736_s18 = smov 0   ;;  %s738_s19 = smov 0   ;;  %s801_s0 = inlined_call_operand.vmem [shape: f32[16,128], index: 0, kind: input, shape index: {}]   ;;  %s802_s1 = inlined_call_operand.vmem [shape: f32[16,128], index: 1, kind: input, shape index: {}]   ;;  %s803_s2 = inlined_call_operand.vmem [shape: f32[16,128], index: 2, kind: input, shape index: {}]   ;;  %s804_s3 = inlined_call_operand.vmem [shape: f32[16,128], index: 3, kind: input, shape index: {}]   ;;  %s805_s4 = inlined_call_operand.vmem [shape: f32[16,128], index: 4, kind: output, shape index: {0}]   ;;  %s806_s5 = inlined_call_operand.vmem [shape: f32[16,128], index: 5, kind: output, shape index: {1}]  }
   0x1   :  { %s740_s20 = smov 0  }
   0x2 LB: > { %s28_s21 = sadd.s32 1, %s700_s19  ;;  %p643_p0 = scmp.ge.s32.totalorder %s704_s20, 1  ;;  %s704_s20 = sphi %s740_s20, %s16_s20   ;;  %s700_s19 = sphi %s738_s19, %s808_s19   ;;  %s696_s18 = sphi %s736_s18, %s807_s18  }
   0x3   : > { %p30_p1 = scmp.ge.s32.totalorder %s28_s21, 2  ;;  %p300_p2 = scmp.lt.s32.totalorder %s704_s20, 3 }
   0x5   : > { %s810_s21 = smov (%p30_p1, %s28_s21), 0  ;;  %p301_p3 = pnand %p643_p0, %p300_p2 }
   0x6   : > { %p367_p4 = scmp.lt.s32.totalorder (!%p301_p3), %s696_s18, 0  ;;  %s654_s23 = sshll.u32 (!%p301_p3), %s696_s18, 5 }
   0x7   : > { %304 = sbr.rel (%p301_p3) target bundleno = 39 (0x27), region = 36  ;;  %s446_s25 = ssub.s32 (!%p301_p3), 16, %s654_s23 }
   0x8   : > { %p430_p6 = scmp.lt.s32.totalorder (!%p301_p3), %s696_s18, 1 }
   0xc   : > { %v447_v0 = vlaneseq  ;;  %s368_s22 = scalar_select %p367_p4, %s696_s18, 0  ;;  %v452_v5 = vstv %s446_s25 }
   0xd   : > { %s814_s18 = smov (!%p430_p6, %s696_s18), 1 }
   0xe   : > { %s644_s24 = sshll.u32 %s368_s22, 2  ;;  %v448_v1 = vshrl.u32 %v447_v0, 7  ;;  %s652_s14 = sshll.u32 %s814_s18, 3 }
   0xf   : > { %p372_p5 = scmp.lt.s32.totalorder %s644_s24, 1  ;;  %s433_s17 = scalar_lea.vmem %s805_s4, %s652_s14 }
  0x10   : > { %v449_v2 = vadd.s32 8, %v448_v1  ;;  %v450_v3 = vadd.s32 16, %v448_v1  ;;  %v451_v4 = vadd.s32 24, %v448_v1  ;;  %vm453_vm0 = vcmp.lt.s32.totalorder %v448_v1, %v452_v5  ;;  %s437_s23 = scalar_lea.vmem %s806_s5, %s652_s14 }
  0x11   : > { %s812_s24 = smov (!%p372_p5, %s644_s24), 1 }
  0x12   : > { %s645_s26 = sshll.u32 %s812_s24, 3  ;;  %vm454_vm1 = vcmp.lt.s32.totalorder %v449_v2, %v452_v5  ;;  %vm455_vm2 = vcmp.lt.s32.totalorder %v450_v3, %v452_v5  ;;  %vm456_vm3 = vcmp.lt.s32.totalorder %v451_v4, %v452_v5 }
  0x13   : > { %s375_s29 = scalar_lea.vmem %s801_s0, %s645_s26  ;;  %s391_s7 = scalar_lea.vmem %s802_s1, %s645_s26 }
  0x14   : > { %v457_v6 = vld [vmem:[%s375_s29] sm:$0xff]  ;;  %v458_v7 = vld [vmem:[%s375_s29 + $0x8] sm:$0xff]  ;;  %v459_v8 = vld [vmem:[%s375_s29 + $0x10] sm:$0xff]  ;;  %s407_s10 = scalar_lea.vmem %s803_s2, %s645_s26  ;;  %s423_s13 = scalar_lea.vmem %s804_s3, %s645_s26 }
  0x15   : > { %v460_v9 = vld [vmem:[%s375_s29 + $0x18] sm:$0xff]  ;;  %v461_v10 = vld [vmem:[%s391_s7] sm:$0xff]  ;;  %v462_v11 = vld [vmem:[%s391_s7 + $0x8] sm:$0xff] }
  0x16   : > { %v463_v12 = vld [vmem:[%s391_s7 + $0x10] sm:$0xff]  ;;  %v464_v13 = vld [vmem:[%s391_s7 + $0x18] sm:$0xff]  ;;  %v465_v14 = vsub.f32 %v457_v6, %v461_v10  ;;  %v466_v15 = vsub.f32 %v458_v7, %v462_v11  ;;  %v481_v16 = vld [vmem:[%s407_s10] sm:$0xff] }
  0x17   : > { %v467_v17 = vsub.f32 %v459_v8, %v463_v12  ;;  %v468_v18 = vsub.f32 %v460_v9, %v464_v13  ;;  %v482_v19 = vld [vmem:[%s407_s10 + $0x8] sm:$0xff]  ;;  %v483_v20 = vld [vmem:[%s407_s10 + $0x10] sm:$0xff]  ;;  %v484_v21 = vld [vmem:[%s407_s10 + $0x18] sm:$0xff] }
  0x18   : > { %v469_v22 = vsel %vm453_vm0, %v465_v14, 0.0  ;;  %v470_v23 = vsel %vm454_vm1, %v466_v15, 0.0  ;;  %v485_v24 = vld [vmem:[%s423_s13] sm:$0xff]  ;;  %v486_v25 = vld [vmem:[%s423_s13 + $0x8] sm:$0xff]  ;;  %v487_v26 = vld [vmem:[%s423_s13 + $0x10] sm:$0xff] }
  0x19   : > { %v471_v27 = vsel %vm455_vm2, %v467_v17, 0.0  ;;  %v472_v28 = vsel %vm456_vm3, %v468_v18, 0.0  ;;  %v473_v29 = vmul.f32 %v469_v22, %v469_v22  ;;  %v474_v30 = vmul.f32 %v470_v23, %v470_v23  ;;  %v488_v31 = vld [vmem:[%s423_s13 + $0x18] sm:$0xff] }
  0x1a   : > { %v475_v32 = vmul.f32 %v471_v27, %v471_v27  ;;  %v489_v33 = vsub.f32 %v481_v16, %v485_v24  ;;  %v490_v34 = vsub.f32 %v482_v19, %v486_v25  ;;  %v476_v35 = vmul.f32 %v472_v28, %v472_v28 }
  0x1b   : > { %v477_v36 = vadd.f32 %v474_v30, %v473_v29  ;;  %v491_v37 = vsub.f32 %v483_v20, %v487_v26  ;;  %v492_v38 = vsub.f32 %v484_v21, %v488_v31 }
  0x1c   : > { %v493_v39 = vsel %vm453_vm0, %v489_v33, 0.0  ;;  %v494_v40 = vsel %vm454_vm1, %v490_v34, 0.0 }
  0x1d   : > { %v478_v41 = vadd.f32 %v477_v36, %v475_v32  ;;  %v495_v42 = vsel %vm455_vm2, %v491_v37, 0.0  ;;  %v496_v43 = vsel %vm456_vm3, %v492_v38, 0.0  ;;  %v497_v44 = vand.u32 2147483647, %v493_v39 }
  0x1e   : > { %v498_v45 = vand.u32 2147483647, %v494_v40  ;;  %v499_v46 = vand.u32 2147483647, %v495_v42  ;;  %v500_v48 = vand.u32 2147483647, %v496_v43 }
  0x1f   : > { %v479_v47 = vadd.f32 %v478_v41, %v476_v35 }
  0x20   : > { %v501_v49 = vadd.f32 %v498_v45, %v497_v44 }
  0x21   : > { %507 = vst [vmem:[%s433_s17] sm:$0xff] %v479_v47 }
  0x22   : > { %v502_v50 = vadd.f32 %v501_v49, %v499_v46 }
  0x24   : > { %v503_v51 = vadd.f32 %v502_v50, %v500_v48 }
  0x26   : > { %510 = vst [vmem:[%s437_s23] sm:$0xff] %v503_v51 }
  0x27 PF: > { %s16_s20 = sadd.s32 1, %s704_s20   ;;  %s807_s18 = smov %s700_s19 }
  0x28   : > { %p13_p7 = scmp.ge.s32.totalorder %s16_s20, 4   ;;  %s808_s19 = smov %s810_s21 }
  0x2a   :  { %15 = sbr.rel (!%p13_p7) target bundleno = 2 (0x2), region = 91 }

</bundles_post_ra>
